<compile_context>
chip_gen: v6e
topology: v6e:2x2x1
jax: 0.10.0
libtpu: 0.0.40
codegen_flags: <defaults>
</compile_context>

<pallas_src>
import jax
import jax.numpy as jnp
from jax.experimental import pallas as pl
from jax.experimental.pallas import tpu as pltpu


def _attention_kernel(q_ref,      # VMEM (TB, Q)
                      k_ref,      # VMEM (TB, M, H)
                      v_ref,      # VMEM (TB, M, V)
                      len_ref,    # VMEM (TB, 1) int32
                      wq_ref,     # VMEM (Q, H)   -- pre-transposed W_query
                      we_ref,     # VMEM (1, H)
                      out_ref,    # VMEM (TB, V)
                      attn_ref):  # VMEM (TB, M)
    f32 = jnp.float32
    TB, M, H = k_ref.shape

    q = q_ref[...].astype(f32)                       # (TB, Q)
    keys = k_ref[...].astype(f32)                    # (TB, M, H)  f32 math (v5e)
    wq = wq_ref[...].astype(f32)                     # (Q, H)
    we = we_ref[...].astype(f32).reshape(1, 1, H)    # (1, 1, H)
    lens = len_ref[...]                              # (TB, 1) int32

    # Query projection on the MXU: (TB, Q) @ (Q, H) -> (TB, H).
    q_proj = jnp.dot(q, wq, preferred_element_type=f32)

    # Additive energies: tanh on the VPU/EUP, then a VPU multiply + cross-lane
    # reduce over H (no transpose, no degenerate 1-row MXU matmul).
    t = jnp.tanh(q_proj[:, None, :] + keys)          # (TB, M, H)
    scores = jnp.sum(t * we, axis=-1)                # (TB, M)

    # Mask memory slots >= memory_lengths[b] with -inf (same as PyTorch;
    # note: length == 0 yields NaN weights, exactly like softmax-of-all--inf).
    idx = jax.lax.broadcasted_iota(jnp.int32, scores.shape, 1)
    scores = jnp.where(idx < lens, scores, f32(-jnp.inf))

    # Numerically stable softmax over M; denominator reciprocal on the EUP.
    m = jnp.max(scores, axis=-1, keepdims=True)
    e = jnp.exp(scores - m)
    s = jnp.sum(e, axis=-1, keepdims=True)
    attn = e * pl.reciprocal(s, approx=True)         # (TB, M)

    # Weighted value retrieval.
    if M >= 128:
        # Large memory: batched MXU matmul (TB batches of (1,M)@(M,V)).
        out = jax.lax.dot_general(
            attn.astype(v_ref.dtype), v_ref[...],
            dimension_numbers=(((1,), (1,)), ((0,), (0,))),
            preferred_element_type=f32)
    else:
        # Small memory: VPU broadcast-multiply + reduce (MXU would be ~empty).
        out = jnp.sum(attn[:, :, None] * v_ref[...].astype(f32), axis=1)

    out_ref[...] = out.astype(out_ref.dtype)
    attn_ref[...] = attn.astype(attn_ref.dtype)


def _pick_block_b(B, M, H, V, itemsize):
    """Batch rows per grid step.

    8-row aligned, ~2 MB of keys+values per step (double-buffered blocks stay
    well under the default scoped-VMEM limit on v5e/v6e/v7x), and at least two
    grid steps when possible so v7x's second TensorCore gets work.
    """
    if B <= 8:
        return B                      # block dims == full dims (layout-legal)
    bytes_per_row = M * (H + V) * itemsize
    tb = max(8, min(256, (2 << 20) // max(bytes_per_row, 1)))
    tb -= tb % 8
    half_rounded = (((B + 1) // 2) + 7) // 8 * 8
    return max(8, min(tb, half_rounded))


def attention_forward(queries, projected_keys, values, memory_lengths,
                      w_query, w_energy, *, block_b=None):
    """Pallas wrapper reproducing Attention.forward semantics.

    queries        [B, 1, Q]
    projected_keys [B, M, H]   (may be bf16 to halve HBM traffic)
    values         [B, M, V]   (may be bf16 to halve HBM traffic)
    memory_lengths [B] ints
    w_query        [H, Q]      (nn.Linear layout: [out, in])
    w_energy       [1, H]
    returns (soft_values_retrieval [B,1,V] f32, attention_weights [B,1,M] f32)
    """
    B, _, Q = queries.shape
    _, M, H = projected_keys.shape
    V = values.shape[-1]

    # One-time layout prep outside the kernel (no per-grid-step transposes,
    # no singleton dims inside the kernel -> lane-dense 2-D slabs).
    q2 = queries.reshape(B, Q)
    wq_t = jnp.transpose(w_query)                               # (Q, H)
    lens = jnp.asarray(memory_lengths, dtype=jnp.int32).reshape(B, 1)

    if block_b is None:
        itemsize = jnp.dtype(projected_keys.dtype).itemsize
        tb = _pick_block_b(B, M, H, V, itemsize)
    else:
        tb = block_b

    B_pad = pl.cdiv(B, tb) * tb
    if B_pad != B:
        pad = B_pad - B
        q2 = jnp.pad(q2, ((0, pad), (0, 0)))
        projected_keys = jnp.pad(projected_keys, ((0, pad), (0, 0), (0, 0)))
        values = jnp.pad(values, ((0, pad), (0, 0), (0, 0)))
        # Padded rows get full length -> finite softmax (no NaN); sliced off.
        lens = jnp.pad(lens, ((0, pad), (0, 0)), constant_values=M)

    grid = (B_pad // tb,)
    grid_spec = pltpu.PrefetchScalarGridSpec(
        num_scalar_prefetch=0,
        grid=grid,
        in_specs=[
            pl.BlockSpec((tb, Q), lambda b: (b, 0)),        # queries
            pl.BlockSpec((tb, M, H), lambda b: (b, 0, 0)),  # projected_keys
            pl.BlockSpec((tb, M, V), lambda b: (b, 0, 0)),  # values
            pl.BlockSpec((tb, 1), lambda b: (b, 0)),        # memory_lengths
            pl.BlockSpec((Q, H), lambda b: (0, 0)),         # W_query^T
            pl.BlockSpec((1, H), lambda b: (0, 0)),         # W_energy
        ],
        out_specs=[
            pl.BlockSpec((tb, V), lambda b: (b, 0)),        # soft retrieval
            pl.BlockSpec((tb, M), lambda b: (b, 0)),        # attention weights
        ],
    )

    out2, attn2 = pl.pallas_call(
        _attention_kernel,
        grid_spec=grid_spec,
        out_shape=(
            jax.ShapeDtypeStruct((B_pad, V), jnp.float32),
            jax.ShapeDtypeStruct((B_pad, M), jnp.float32),
        ),
        compiler_params=pltpu.CompilerParams(
            dimension_semantics=("parallel",)),
    )(q2, projected_keys, values, lens, wq_t, w_energy)

    soft_values = out2[:B].reshape(B, 1, V)
    attn_weights = attn2[:B].reshape(B, 1, M)
    return soft_values, attn_weights


def _reference(queries, projected_keys, values, memory_lengths, w_query, w_energy):
    """Plain-JAX reference of the PyTorch forward pass."""
    q_proj = jnp.einsum("bod,hd->boh", queries, w_query)            # (B,1,H)
    t = jnp.tanh(q_proj + projected_keys)                           # (B,M,H)
    scores = jnp.einsum("bmh,oh->bmo", t, w_energy)[..., 0]         # (B,M)
    scores = scores[:, None, :]                                     # (B,1,M)
    M = projected_keys.shape[1]
    mask = jnp.arange(M)[None, :] < memory_lengths[:, None]         # (B,M)
    scores = jnp.where(mask[:, None, :], scores, -jnp.inf)
    attn = jax.nn.softmax(scores, axis=2)
    out = jnp.einsum("bom,bmv->bov", attn, values)
    return out, attn


def _run_case(key, B, M, Q, H, V, lengths):
    k1, k2, k3, k4, k5 = jax.random.split(key, 5)
    queries = jax.random.normal(k1, (B, 1, Q), dtype=jnp.float32)
    projected_keys = jax.random.normal(k2, (B, M, H), dtype=jnp.float32)
    values = jax.random.normal(k3, (B, M, V), dtype=jnp.float32)
    memory_lengths = jnp.asarray(lengths, dtype=jnp.int32)
    w_query = jax.random.normal(k4, (H, Q), dtype=jnp.float32) * 0.1
    w_energy = jax.random.normal(k5, (1, H), dtype=jnp.float32) * 0.1
    # TODO(synk): key_layer weight ([H, key_size]) exists in __init__ but is
    # unused in forward(), so it is omitted here.

    soft_values, attn_weights = attention_forward(
        queries, projected_keys, values, memory_lengths, w_query, w_energy)
    jax.block_until_ready((soft_values, attn_weights))

    ref_out, ref_attn = _reference(
        queries, projected_keys, values, memory_lengths, w_query, w_energy)

    assert soft_values.shape == (B, 1, V)
    assert attn_weights.shape == (B, 1, M)
    # Tolerance loosened slightly because the softmax denominator uses the
    # EUP approximate reciprocal (pl.reciprocal(approx=True)).
    assert jnp.allclose(soft_values, ref_out, atol=2e-3, rtol=2e-3)
    assert jnp.allclose(attn_weights, ref_attn, atol=2e-3, rtol=2e-3)


if __name__ == "__main__":
    key = jax.random.PRNGKey(0)
    k_a, k_b = jax.random.split(key)

    # Small shapes consistent with the module's forward contract.
    B, M, Q, H, V = 2, 8, 32, 32, 32
    _run_case(k_a, B, M, Q, H, V, lengths=[M, 5])

    # Larger odd batch: exercises batch-blocking, padding, and a multi-step
    # parallel grid (>= 2 steps -> both v7x TensorCores get work).
    B2 = 37
    lens2 = [(i % M) + 1 for i in range(B2)]
    _run_case(k_b, B2, M, Q, H, V, lengths=lens2)

    print("KERNEL_OK")
</pallas_src>

<mosaic_0001>
module attributes {stable_mosaic.version = 11 : i64} {
  func.func @_attention_kernel(%arg0: i32, %arg1: memref<2x32xf32, #tpu.memory_space<vmem>>, %arg2: memref<2x8x32xf32, #tpu.memory_space<vmem>>, %arg3: memref<2x8x32xf32, #tpu.memory_space<vmem>>, %arg4: memref<2x1xi32, #tpu.memory_space<vmem>>, %arg5: memref<32x32xf32, #tpu.memory_space<vmem>>, %arg6: memref<1x32xf32, #tpu.memory_space<vmem>>, %arg7: memref<2x32xf32, #tpu.memory_space<vmem>>, %arg8: memref<2x8xf32, #tpu.memory_space<vmem>>) attributes {dimension_semantics = [#tpu.dimension_semantics<parallel>], iteration_bounds = array<i64: 1>, scalar_prefetch = 0 : i64, scratch_operands = 0 : i64, tpu.core_type = #tpu.core_type<tc>, window_params = [{transform_indices = @transform_0, window_bounds = array<i64: 2, 32>}, {transform_indices = @transform_1, window_bounds = array<i64: 2, 8, 32>}, {transform_indices = @transform_2, window_bounds = array<i64: 2, 8, 32>}, {transform_indices = @transform_3, window_bounds = array<i64: 2, 1>}, {pipeline_mode = #tpu.pipeline_mode<synchronous>, transform_indices = @transform_4, window_bounds = array<i64: 32, 32>}, {pipeline_mode = #tpu.pipeline_mode<synchronous>, transform_indices = @transform_5, window_bounds = array<i64: 1, 32>}, {transform_indices = @transform_6, window_bounds = array<i64: 2, 32>}, {transform_indices = @transform_7, window_bounds = array<i64: 2, 8>}]} {
    %c0 = arith.constant 0 : index
    %c0_0 = arith.constant 0 : index
    %0 = vector.load %arg1[%c0, %c0_0] : memref<2x32xf32, #tpu.memory_space<vmem>>, vector<2x32xf32>
    %c0_1 = arith.constant 0 : index
    %c0_2 = arith.constant 0 : index
    %c0_3 = arith.constant 0 : index
    %1 = vector.load %arg2[%c0_1, %c0_2, %c0_3] : memref<2x8x32xf32, #tpu.memory_space<vmem>>, vector<2x8x32xf32>
    %c0_4 = arith.constant 0 : index
    %c0_5 = arith.constant 0 : index
    %2 = vector.load %arg5[%c0_4, %c0_5] : memref<32x32xf32, #tpu.memory_space<vmem>>, vector<32x32xf32>
    %c0_6 = arith.constant 0 : index
    %c0_7 = arith.constant 0 : index
    %3 = vector.load %arg6[%c0_6, %c0_7] : memref<1x32xf32, #tpu.memory_space<vmem>>, vector<1x32xf32>
    %4 = vector.shape_cast %3 : vector<1x32xf32> to vector<1x1x32xf32>
    %c0_8 = arith.constant 0 : index
    %c0_9 = arith.constant 0 : index
    %5 = vector.load %arg4[%c0_8, %c0_9] : memref<2x1xi32, #tpu.memory_space<vmem>>, vector<2x1xi32>
    %cst = arith.constant dense<0.000000e+00> : vector<2x32xf32>
    %6 = tpu.matmul %0, %2, %cst {dimension_numbers = #tpu.dot_dimension_numbers<[1], [0], [0], [1], [0, 0, 1, 1], [], []>} : vector<2x32xf32>, vector<32x32xf32>, vector<2x32xf32> -> vector<2x32xf32>
    %7 = vector.shape_cast %6 : vector<2x32xf32> to vector<2x1x32xf32>
    %8 = vector.broadcast %7 : vector<2x1x32xf32> to vector<2x8x32xf32>
    %9 = arith.addf %8, %1 : vector<2x8x32xf32>
    %10 = math.tanh %9 : vector<2x8x32xf32>
    %11 = vector.broadcast %4 : vector<1x1x32xf32> to vector<2x8x32xf32>
    %12 = arith.mulf %10, %11 : vector<2x8x32xf32>
    %cst_10 = arith.constant dense<0.000000e+00> : vector<2x8xf32>
    %13 = vector.multi_reduction <add>, %12, %cst_10 [2] : vector<2x8x32xf32> to vector<2x8xf32>
    %14 = tpu.iota {dimensions = array<i32: 1>} : vector<2x8xi32>
    %15 = vector.broadcast %5 : vector<2x1xi32> to vector<2x8xi32>
    %16 = arith.cmpi slt, %14, %15 : vector<2x8xi32>
    %cst_11 = arith.constant 0xFF800000 : f32
    %17 = vector.broadcast %cst_11 : f32 to vector<2x8xf32>
    %18 = arith.select %16, %13, %17 : vector<2x8xi1>, vector<2x8xf32>
    %cst_12 = arith.constant dense<0xFF800000> : vector<2xf32>
    %19 = vector.multi_reduction <maximumf>, %18, %cst_12 [1] : vector<2x8xf32> to vector<2xf32>
    %20 = vector.shape_cast %19 : vector<2xf32> to vector<2x1xf32>
    %21 = vector.broadcast %20 : vector<2x1xf32> to vector<2x8xf32>
    %22 = arith.subf %18, %21 : vector<2x8xf32>
    %23 = math.exp %22 : vector<2x8xf32>
    %cst_13 = arith.constant dense<0.000000e+00> : vector<2xf32>
    %24 = vector.multi_reduction <add>, %23, %cst_13 [1] : vector<2x8xf32> to vector<2xf32>
    %25 = vector.shape_cast %24 : vector<2xf32> to vector<2x1xf32>
    %26 = tpu.reciprocal %25 {approx = true} : vector<2x1xf32> -> vector<2x1xf32>
    %27 = vector.broadcast %26 : vector<2x1xf32> to vector<2x8xf32>
    %28 = arith.mulf %23, %27 : vector<2x8xf32>
    %29 = vector.shape_cast %28 : vector<2x8xf32> to vector<2x8x1xf32>
    %c0_14 = arith.constant 0 : index
    %c0_15 = arith.constant 0 : index
    %c0_16 = arith.constant 0 : index
    %30 = vector.load %arg3[%c0_14, %c0_15, %c0_16] : memref<2x8x32xf32, #tpu.memory_space<vmem>>, vector<2x8x32xf32>
    %31 = vector.broadcast %29 : vector<2x8x1xf32> to vector<2x8x32xf32>
    %32 = arith.mulf %31, %30 : vector<2x8x32xf32>
    %cst_17 = arith.constant dense<0.000000e+00> : vector<2x32xf32>
    %33 = vector.multi_reduction <add>, %32, %cst_17 [1] : vector<2x8x32xf32> to vector<2x32xf32>
    %c0_18 = arith.constant 0 : index
    %c0_19 = arith.constant 0 : index
    %34 = vector.load %arg7[%c0_18, %c0_19] : memref<2x32xf32, #tpu.memory_space<vmem>>, vector<2x32xf32>
    tpu.vector_store %arg7[%c0_18, %c0_19], %33 {strides = array<i32>} : memref<2x32xf32, #tpu.memory_space<vmem>>, vector<2x32xf32>,
    %c0_20 = arith.constant 0 : index
    %c0_21 = arith.constant 0 : index
    %35 = vector.load %arg8[%c0_20, %c0_21] : memref<2x8xf32, #tpu.memory_space<vmem>>, vector<2x8xf32>
    tpu.vector_store %arg8[%c0_20, %c0_21], %28 {strides = array<i32>} : memref<2x8xf32, #tpu.memory_space<vmem>>, vector<2x8xf32>,
    return
  }
  func.func @transform_0(%arg0: i32) -> (i32, i32) {
    %c0_i32 = arith.constant 0 : i32
    %c0_i32_0 = arith.constant 0 : i32
    return %arg0, %c0_i32 : i32, i32
  }
  func.func @transform_1(%arg0: i32) -> (i32, i32, i32) {
    %c0_i32 = arith.constant 0 : i32
    %c0_i32_0 = arith.constant 0 : i32
    %c0_i32_1 = arith.constant 0 : i32
    return %arg0, %c0_i32, %c0_i32_0 : i32, i32, i32
  }
  func.func @transform_2(%arg0: i32) -> (i32, i32, i32) {
    %c0_i32 = arith.constant 0 : i32
    %c0_i32_0 = arith.constant 0 : i32
    %c0_i32_1 = arith.constant 0 : i32
    return %arg0, %c0_i32, %c0_i32_0 : i32, i32, i32
  }
  func.func @transform_3(%arg0: i32) -> (i32, i32) {
    %c0_i32 = arith.constant 0 : i32
    %c0_i32_0 = arith.constant 0 : i32
    return %arg0, %c0_i32 : i32, i32
  }
  func.func @transform_4(%arg0: i32) -> (i32, i32) {
    %c0_i32 = arith.constant 0 : i32
    %c0_i32_0 = arith.constant 0 : i32
    %c0_i32_1 = arith.constant 0 : i32
    return %c0_i32, %c0_i32_0 : i32, i32
  }
  func.func @transform_5(%arg0: i32) -> (i32, i32) {
    %c0_i32 = arith.constant 0 : i32
    %c0_i32_0 = arith.constant 0 : i32
    %c0_i32_1 = arith.constant 0 : i32
    return %c0_i32, %c0_i32_0 : i32, i32
  }
  func.func @transform_6(%arg0: i32) -> (i32, i32) {
    %c0_i32 = arith.constant 0 : i32
    %c0_i32_0 = arith.constant 0 : i32
    return %arg0, %c0_i32 : i32, i32
  }
  func.func @transform_7(%arg0: i32) -> (i32, i32) {
    %c0_i32 = arith.constant 0 : i32
    %c0_i32_0 = arith.constant 0 : i32
    return %arg0, %c0_i32 : i32, i32
  }
}

</mosaic_0001>

<bundles_post_ra>
// kernel: tpu_custom_call.1
= control target key start
LH: loop header
LB: loop body
LE: loop exit
PB: predicated region body
PF: predicated region fallthrough
CT: control target
= control target key end

     0   :  { %13 = vsyncpa [#allocation3], 0  ;;  %s535_s0 = inlined_call_operand.vmem [shape: f32[2,32], index: 0, kind: input, shape index: {}]   ;;  %s536_s1 = inlined_call_operand.hbm [shape: f32[2,8,32], index: 1, kind: input, shape index: {}]   ;;  %s537_s2 = inlined_call_operand.hbm [shape: f32[2,8,32], index: 2, kind: input, shape index: {}]   ;;  %s538_s3 = inlined_call_operand.vmem [shape: s32[2,1], index: 3, kind: input, shape index: {}]   ;;  %s539_s4 = inlined_call_operand.hbm [shape: f32[32,32], index: 4, kind: input, shape index: {}]   ;;  %s540_s5 = inlined_call_operand.vmem [shape: f32[1,32], index: 5, kind: input, shape index: {}]   ;;  %s541_s6 = inlined_call_operand.hbm [shape: f32[2,32], index: 6, kind: output, shape index: {0}]   ;;  %s542_s7 = inlined_call_operand.hbm [shape: f32[2,8], index: 7, kind: output, shape index: {1}]  }
   0x1   :  { %14 = vsyncpa [#allocation6], 0 }
   0x2   :  { %15 = vsyncpa [#allocation4], 0 }
   0x3   :  { %16 = vsyncpa [#allocation10], 0  ;;  %s450_s24 = smov [#allocation5]   ;;  %s451_s26 = smov [#allocation2]  }
   0x4   :  { %s36_s25 = sshll.u32 %s450_s24, 4  ;;  %s24_s27 = sshll.u32 %s451_s26, 4  ;;  %s37_s25 = int_to_ptr.vmem [resolvable:$true] %s36_s25  ;;  %s25_s27 = int_to_ptr.vmem [resolvable:$true] %s24_s27 }
   0x5   :  { %s350_s28 = scalar_lea.vmem %s37_s25, 256  ;;  %p355_p1 = scmp.lt.s32.totalorder %s37_s25, %s37_s25 }
   0x6   :  { %p351_p0 = scmp.ne.s32.totalorder %s37_s25, %s350_s28  ;;  %p356_p2 = scmp.lt.s32.totalorder %s350_s28, %s350_s28 }
   0x8   :  { %p357_p3 = por %p356_p2, %p355_p1 }
   0xa   :  { %p358_p4 = pnand %p357_p3, %p351_p0 }
   0xc   :  { %361 = shalt.err (!%p358_p4)
}
   0xd   :  { %s452_s29 = smov 128   ;;  %s453_s30 = smov 8  }
   0xe   :  { %42 = dma.hbm_to_vmem [thread:$0]  %s537_s2, 256, %s37_s25, [#allocation6], %s452_s29, %s452_s29, %s453_s30  }
   0xf   :  { %s370_s10 = scalar_lea.vmem %s25_s27, 256  ;;  %p375_p6 = scmp.lt.s32.totalorder %s25_s27, %s25_s27 }
  0x10   :  { %p371_p5 = scmp.ne.s32.totalorder %s25_s27, %s370_s10  ;;  %p376_p7 = scmp.lt.s32.totalorder %s370_s10, %s370_s10 }
  0x12   :  { %p377_p8 = por %p376_p7, %p375_p6 }
  0x14   :  { %p378_p9 = pnand %p377_p8, %p371_p5 }
  0x16   :  { %381 = shalt.err (!%p378_p9)
}
  0x17   :  { %30 = dma.hbm_to_vmem [thread:$0]  %s536_s1, 256, %s25_s27, [#allocation3], %s452_s29, %s452_s29, %s453_s30  }
  0x18   :  { %s454_s13 = smov [#allocation7]  }
  0x19   :  { %s50_s14 = sshll.u32 %s454_s13, 4  ;;  %s51_s14 = int_to_ptr.vmem [resolvable:$true] %s50_s14 }
  0x1a   :  { %s390_s15 = scalar_lea.vmem %s51_s14, 512  ;;  %p395_p11 = scmp.lt.s32.totalorder %s51_s14, %s51_s14 }
  0x1b   :  { %p391_p10 = scmp.ne.s32.totalorder %s51_s14, %s390_s15  ;;  %p396_p12 = scmp.lt.s32.totalorder %s390_s15, %s390_s15 }
  0x1d   :  { %p397_p13 = por %p396_p12, %p395_p11 }
  0x1f   :  { %p398_p0 = pnand %p397_p13, %p391_p10 }
  0x21   :  { %401 = shalt.err (!%p398_p0)
}
  0x22   :  { %56 = dma.hbm_to_vmem [thread:$0]  %s539_s4, 512, %s51_s14, [#allocation6], %s452_s29, %s452_s29, %s453_s30  }
  0x23   :  { %442 = dma.done.wait [#allocation3], 256  }
  0x24   :  { %443 = vsyncadd [#allocation3], 4294967040 }
  0x25   :  { %444 = dma.done.wait [#allocation6], 768  }
  0x26   :  { %445 = vsyncadd [#allocation6], 4294966528  ;;  %v455_v0 = vmov 0.0   ;;  %vm456_vm0 = vmmov 0   ;;  %v74_v1 = vld [vmem:[#allocation7 + $0x18] sm:$0xff]  ;;  %v73_v2 = vld [vmem:[#allocation7 + $0x10] sm:$0xff]  ;;  %v155_v10 = vlaneseq }
  0x27   :  { %310 = vmatprep.subr.mxu0 %v455_v0  ;;  %318 = vmatprep.mubr.msk.f32.mxu0 %vm456_vm0, %v455_v0  ;;  %v72_v3 = vld [vmem:[#allocation7 + $0x8] sm:$0xff]  ;;  %v71_v4 = vld [vmem:[#allocation7] sm:$0xff]  ;;  %vm77_vm1 = vcmask 261120   ;;  %v457_v7 = vmov 0   ;;  %v458_v8 = vmov 1966171168  }
  0x28   :  { %311 = vmatpush3.msra.mxu0 %v74_v1  ;;  %v68_v5 = vld [vmem:[%s535_s0] sm:$0x3]  ;;  %332 = vset.pattern.permute.xlu1 %v457_v7  ;;  %v153_v9 = vunpack.c.l.s4 %v458_v8  ;;  %v156_v12 = vshrl.u32 %v155_v10, 7  ;;  %v70_v23 = vld [vmem:[#allocation2 + $0x8] sm:$0xff]  ;;  %v203_v34 = vand.u32 127, %v155_v10  ;;  %vm218_vm2 = vcmask 1041409  }
  0x29   :  { %312 = vmatprep.subr.mxu0 %v455_v0  ;;  %v76_v6 = vld [vmem:[%s538_s3] sm:$0x3]  ;;  %333 = vset.pattern.permute.xlu0 %v457_v7  ;;  %vm222_vm4 = vcmask 58368  }
  0x2a   :  { %313 = vmatpush3.msra.mxu0 %v73_v2  ;;  %205 = vperm.xlu1 %332, %v76_v6   ;;  %v154_v11 = vunpack.c.0.s8 %v153_v9  ;;  %v176_v16 = vsub.s32 0, %v156_v12  ;;  %v69_v20 = vld [vmem:[#allocation2] sm:$0xff]  ;;  %v212_v36 = vsub.s32 %v203_v34, %v156_v12  ;;  %v243_v53 = vsub.s32 1, %v156_v12 }
  0x2b   :  { %314 = vmatprep.subr.mxu0 %v455_v0  ;;  %v304_v27 = vld [vmem:[%s540_s5] ss:$0 sm:$0xff]  ;;  %s459_s5 = smov [#allocation9]  }
  0x2c   :  { %315 = vmatpush3.msra.mxu0 %v72_v3  ;;  %v157_v13 = vsub.s32 %v154_v11, %v156_v12  ;;  %s289_s19 = sshll.u32 %s459_s5, 4  ;;  %s290_s19 = int_to_ptr.vmem [resolvable:$true] %s289_s19 }
  0x2d   :  { %316 = vmatprep.subr.mxu0 %v455_v0  ;;  %s402_s20 = scalar_lea.vmem %s290_s19, 32  ;;  %p407_p2 = scmp.lt.s32.totalorder %s290_s19, %s290_s19 }
  0x2e   :  { %317 = vmatpush3.msra.mxu0 %v71_v4  ;;  %p403_p1 = scmp.ne.s32.totalorder %s290_s19, %s402_s20  ;;  %p408_p3 = scmp.lt.s32.totalorder %s402_s20, %s402_s20 }
  0x2f   :  { %319 = vmatmul.mubr.msk.f32.vlgmr.msra.gmra.mxu0 %vm77_vm1, %v68_v5 }
  0x30   :  { %p409_p4 = por %p408_p3, %p407_p2 }
  0x32   :  { %p410_p5 = pnand %p409_p4, %p403_p1 }
  0xa5   :  { %v206_v37 = vpop.permute.xlu1 %205 }
  0xa6   :  { %vm207_vm3 = vcmp.lt.s32.totalorder %v203_v34, %v206_v37 }
  0xef   :  { %v147_v14 = vpop.f32.mrf.mxu0 }
  0xf0   :  { %v158_v15 = vrot.slane %v147_v14, %v157_v13 }
  0xf1   :  { %v320_v17 = vpop.f32.mrf.mxu0 }
  0xf2   :  { %v159_v18 = vcombine.high %v158_v15, %v158_v15  ;;  %v166_v19 = vrot.slane %v158_v15, %v157_v13 }
  0xf4   :  { %v173_v21 = vrot.slane %v159_v18, %v157_v13  ;;  %v177_v22 = vrot.slane %v166_v19, %v176_v16 }
  0xf6   :  { %v181_v24 = vrot.slane %v173_v21, %v176_v16  ;;  %v184_v25 = vadd.f32 %v177_v22, %v69_v20 }
  0xf8   :  { %v185_v26 = vadd.f32 %v181_v24, %v70_v23  ;;  %334 = vtanh.f32 %v184_v25 }
  0xfa   :  { %336 = vtanh.f32 %v185_v26 }
 0x105   :  { %v335_v28 = vpop.eup %334 }
 0x106   :  { %v194_v29 = vmul.f32 %v335_v28, %v304_v27 }
 0x107   :  { %v337_v30 = vpop.eup %336 }
 0x108   :  { %v196_v31 = vsel %vm77_vm1, %v194_v29, 0.0  ;;  %v195_v32 = vmul.f32 %v337_v30, %v304_v27 }
 0x109   :  { %197 = vadd.xlane.f32.xlu0 %v196_v31 }
 0x10a   :  { %v199_v33 = vsel %vm77_vm1, %v195_v32, 0.0 }
 0x10d   :  { %200 = vadd.xlane.f32.xlu0 %v199_v33 }
 0x192   :  { %v198_v35 = vpop.xlane.xlu0 %197 }
 0x193   :  { %v213_v39 = vrot.slane %v198_v35, %v212_v36 }
 0x196   :  { %v201_v38 = vpop.xlane.xlu0 %200 }
 0x197   :  { %v217_v40 = vrot.slane %v201_v38, %v212_v36 }
 0x199   :  { %v219_v41 = vsel %vm218_vm2, %v217_v40, %v213_v39 }
 0x19a   :  { %v221_v42 = vsel %vm207_vm3, %v219_v41, -inf }
 0x19b   :  { %v223_v43 = vsel %vm222_vm4, %v221_v42, -inf }
 0x19c   :  { %224 = vmax.xlane.f32.xlu1 %v223_v43 }
 0x225   :  { %v225_v44 = vpop.xlane.xlu1 %224 }
 0x226   :  { %v226_v45 = vsub.f32 %v221_v42, %v225_v44 }
 0x228   :  { %v227_v46 = vmul.f32 1.442695, %v226_v45 }
 0x22a   :  { %338 = vpow2.f32 %v227_v46 }
 0x237   :  { %v339_v47 = vpop.eup %338 }
 0x238   :  { %v229_v48 = vsel %vm222_vm4, %v339_v47, 0.0 }
 0x239   :  { %230 = vadd.xlane.f32.xlu0 %v229_v48 }
 0x2c2   :  { %v231_v49 = vpop.xlane.xlu0 %230 }
 0x2c3   :  { %340 = vrcp.f32 %v231_v49 }
 0x2d0   :  { %v341_v50 = vpop.eup %340 }
 0x2d1   :  { %v233_v51 = vmul.f32 %v341_v50, %v339_v47 }
 0x2d3   :  { %v237_v52 = vrot.slane %v233_v51, %v176_v16  ;;  %272 = vst.msk [vmem:[#allocation9] sm:$0x3] %vm222_vm4, %v233_v51  ;;  %v244_v54 = vrot.slane %v233_v51, %v243_v53 }
 0x2d5   :  { %239 = vbcast.lane.b32.xlu0 %v237_v52, 256 }
 0x2d9   :  { %246 = vbcast.lane.b32.xlu0 %v244_v54, 256 }
 0x2da   :  { %413 = shalt.err (!%p410_p5)
}
 0x2db   :  { %292 = dma.vmem_to_hbm [thread:$0]  %s290_s19, 32, %s542_s7, [#allocation10]   ;;  %v248_v55 = vld [vmem:[#allocation5] sm:$0xff]  ;;  %v249_v58 = vld [vmem:[#allocation5 + $0x8] sm:$0xff]  ;;  %vm270_vm5 = vcmask 254976  }
 0x2dc   :  { %s460_s7 = smov [#allocation8]  }
 0x2dd   :  { %s279_s23 = sshll.u32 %s460_s7, 4  ;;  %s280_s23 = int_to_ptr.vmem [resolvable:$true] %s279_s23 }
 0x2de   :  { %s422_s24 = scalar_lea.vmem %s280_s23, 32  ;;  %p427_p7 = scmp.lt.s32.totalorder %s280_s23, %s280_s23 }
 0x2df   :  { %p423_p6 = scmp.ne.s32.totalorder %s280_s23, %s422_s24  ;;  %p428_p8 = scmp.lt.s32.totalorder %s422_s24, %s422_s24 }
 0x2e1   :  { %p429_p9 = por %p428_p8, %p427_p7 }
 0x2e3   :  { %p430_p10 = pnand %p429_p9, %p423_p6 }
 0x347   :  { %v240_v56 = vpop.permute.xlu0 %239 }
 0x348   :  { %v250_v57 = vmul.f32 %v248_v55, %v240_v56 }
 0x34a   :  { %v252_v59 = vsel %vm77_vm1, %v250_v57, 0.0 }
 0x34b   :  { %v253_v60 = vrot.slane %v252_v59, 4  ;;  %v247_v61 = vpop.permute.xlu0 %246 }
 0x34c   :  { %v251_v62 = vmul.f32 %v249_v58, %v247_v61 }
 0x34d   :  { %v254_v63 = vadd.f32 %v253_v60, %v252_v59 }
 0x34e   :  { %v259_v0 = vsel %vm77_vm1, %v251_v62, 0.0 }
 0x34f   :  { %v255_v1 = vrot.slane %v254_v63, 2  ;;  %v260_v2 = vrot.slane %v259_v0, 4 }
 0x351   :  { %v256_v3 = vadd.f32 %v255_v1, %v254_v63  ;;  %v261_v4 = vadd.f32 %v260_v2, %v259_v0 }
 0x353   :  { %v262_v5 = vrot.slane %v261_v4, 2  ;;  %v257_v6 = vrot.slane %v256_v3, 1 }
 0x355   :  { %v263_v7 = vadd.f32 %v262_v5, %v261_v4  ;;  %v258_v9 = vadd.f32 %v257_v6, %v256_v3 }
 0x357   :  { %v264_v8 = vrot.slane %v263_v7, 1 }
 0x359   :  { %v265_v10 = vadd.f32 %v264_v8, %v263_v7 }
 0x35b   :  { %v268_v11 = vsel %vm218_vm2, %v265_v10, %v258_v9 }
 0x35c   :  { %271 = vst.msk [vmem:[#allocation8] sm:$0x3] %vm270_vm5, %v268_v11 }
 0x35d   :  { %433 = shalt.err (!%p430_p10)
}
 0x35e   :  { %282 = dma.vmem_to_hbm [thread:$0]  %s280_s23, 32, %s541_s6, [#allocation4]  }
 0x35f   :  { %446 = dma.done.wait [#allocation4], 32  }
 0x360   :  { %447 = vsyncadd [#allocation4], 4294967264 }
 0x361   :  { %448 = dma.done.wait [#allocation10], 32  }
 0x362   :  { %449 = vsyncadd [#allocation10], 4294967264 }
 0x363   :  { %299 = vsyncpa [#allocation3], 1 }
 0x364   :  { %300 = vsyncpa [#allocation6], 1 }
 0x365   :  { %301 = vsyncpa [#allocation4], 1 }
 0x366   :  { %302 = vsyncpa [#allocation10], 1 }

</bundles_post_ra>
